<compile_context>
chip_gen: v6e
topology: v6e:2x2x1
jax: 0.10.0
libtpu: 0.0.40
codegen_flags: <defaults>
</compile_context>

<pallas_src>
import math
from functools import partial

import jax
import jax.numpy as jnp
from jax.experimental import pallas as pl
from jax.experimental.pallas import tpu as pltpu

EPS = 1e-6


def _fast_recip(x):
    """1/x via EUP approximate reciprocal + one Newton-Raphson refinement.

    Moves the divide off the VALU slots (the EUP has its own issue slot); one
    refinement restores ~f32 accuracy (err ~ eps_approx**2) at negligible cost
    on the tiny [.., 1] denominator tensors.
    """
    r = pl.reciprocal(x, approx=True)
    return r * (2.0 - x * r)


def _torch_layernorm(x, a, b):
    """Torch-custom LayerNorm: a * (x - mean) / (std_unbiased + eps) + b."""
    d = x.shape[-1]
    mean = jnp.mean(x, axis=-1, keepdims=True)
    var = jnp.sum((x - mean) ** 2, axis=-1, keepdims=True) * (1.0 / (d - 1))
    inv = _fast_recip(jnp.sqrt(var) + EPS)
    return a * (x - mean) * inv + b


def att_layer_kernel(x_ref, pe_ref, wqkv_ref, bqkv_ref, wo_ref, bo_ref,
                     a1_ref, b1_ref, a2_ref, b2_ref, o_ref,
                     *, h_num, h_dim, mxu_dtype):
    Bb, S, D = x_ref.shape
    HH = h_num * h_dim
    Dout = o_ref.shape[-1]

    cast = lambda t: t.astype(mxu_dtype)          # identity when mxu_dtype==f32

    # ---- positional encoding (pe broadcasts over the batch block) ------------
    x = x_ref[...] + pe_ref[...]                  # [Bb, S, D]
    xf = x.reshape(Bb * S, D)                     # fold batch into rows

    # ---- fused Q|K|V projection: one [Bb*S, D] x [D, 3*HH] MXU op ------------
    bqkv = bqkv_ref[...]                          # [1, 3*HH]
    qkv = jnp.dot(cast(xf), cast(wqkv_ref[...]),
                  preferred_element_type=jnp.float32) + bqkv
    q = qkv[:, 0 * HH:1 * HH].reshape(Bb, S, HH)
    k = qkv[:, 1 * HH:2 * HH].reshape(Bb, S, HH)
    v = jnp.maximum(qkv[:, 2 * HH:3 * HH], 0.0).reshape(Bb, S, HH)  # ReLU V path

    # ---- scaled dot-product attention, heads unrolled, batched over Bb -------
    # TODO(synk): a full [Bb,H,S,Hd] head-major transpose would also remove the
    # per-head lane slices, but that transpose mixes tiled and untiled dims and
    # is not reliably lowered by Mosaic at these shapes; batching the dots over
    # the batch dim already removes the per-batch matmul chains / batch grid.
    scale = 1.0 / math.sqrt(h_dim)
    head_outs = []
    for h in range(h_num):                        # static unroll over heads
        sl = slice(h * h_dim, (h + 1) * h_dim)
        qh, kh, vh = q[..., sl], k[..., sl], v[..., sl]      # [Bb, S, Hd]
        s = jnp.einsum('bqd,bkd->bqk', cast(qh), cast(kh),
                       preferred_element_type=jnp.float32) * scale
        s = s - jnp.max(s, axis=-1, keepdims=True)
        p = jnp.exp(s)
        p = p * _fast_recip(jnp.sum(p, axis=-1, keepdims=True))  # softmax
        ho = jnp.einsum('bqk,bkd->bqd', cast(p), cast(vh),
                        preferred_element_type=jnp.float32)
        head_outs.append(ho.reshape(Bb * S, h_dim))
    att = jnp.concatenate(head_outs, axis=-1)     # [Bb*S, HH]

    # ---- ft_map: Linear -> ReLU -> LayerNorm ----------------------------------
    y = jnp.dot(cast(att), cast(wo_ref[...]),
                preferred_element_type=jnp.float32) + bo_ref[...]
    y = jnp.maximum(y, 0.0)
    y = _torch_layernorm(y, a1_ref[...], b1_ref[...])

    # ---- residual + final LayerNorm -------------------------------------------
    z = _torch_layernorm(xf + y, a2_ref[...], b2_ref[...])
    o_ref[...] = z.reshape(Bb, S, Dout)
    # TODO(synk): for large S (time_len*22 in the hundreds) add a query-block
    # grid axis with an online-softmax accumulator and explicit
    # vmem_limit_bytes (mandatory on v7x's 64 MiB VMEM); monolithic [S,S]
    # scores are fine at these test shapes.


def att_layer_pallas(x, pe, params, *, h_num, h_dim, grid_blocks=1,
                     mxu_dtype=jnp.float32):
    """grid_blocks=1 -> whole batch in one step (v5e/v6e, 1 TensorCore);
    grid_blocks=2 -> two fat parallel steps, one per v7x TensorCore."""
    B, S, D = x.shape
    Dout = params["wo"].shape[1]
    assert B % grid_blocks == 0
    Bb = B // grid_blocks

    # Fuse Q|K|V weights / biases once in the wrapper (free, outside kernel).
    wqkv = jnp.concatenate([params["wq"], params["wk"], params["wv"]], axis=1)
    bqkv = jnp.concatenate([params["bq"], params["bk"], params["bv"]], axis=1)

    args = (x, pe, wqkv, bqkv, params["wo"], params["bo"],
            params["a1"], params["b1"], params["a2"], params["b2"])

    def full2d(a):
        return pl.BlockSpec(a.shape, lambda i: (0, 0))

    in_specs = [pl.BlockSpec((Bb, S, D), lambda i: (i, 0, 0))] + \
               [full2d(a) for a in args[1:]]

    kernel = partial(att_layer_kernel, h_num=h_num, h_dim=h_dim,
                     mxu_dtype=mxu_dtype)
    return pl.pallas_call(
        kernel,
        out_shape=jax.ShapeDtypeStruct((B, S, Dout), jnp.float32),
        grid=(grid_blocks,),
        in_specs=in_specs,
        out_specs=pl.BlockSpec((Bb, S, Dout), lambda i: (i, 0, 0)),
        compiler_params=pltpu.CompilerParams(
            dimension_semantics=("parallel",)),
    )(*args)


# ----------------------------- glue / setup ---------------------------------

def make_positional_encoding(seq_len, d_model):
    position = jnp.arange(seq_len, dtype=jnp.float32)[:, None]
    div_term = jnp.exp(jnp.arange(0, d_model, 2, dtype=jnp.float32)
                       * -(math.log(10000.0) / d_model))
    pe = jnp.zeros((seq_len, d_model), jnp.float32)
    pe = pe.at[:, 0::2].set(jnp.sin(position * div_term))
    pe = pe.at[:, 1::2].set(jnp.cos(position * div_term))
    return pe


def init_params(key, input_size, output_size, h_num, h_dim):
    hh = h_num * h_dim
    ks = jax.random.split(key, 8)

    def xavier(k, fan_in, fan_out):
        bound = math.sqrt(6.0 / (fan_in + fan_out))
        return jax.random.uniform(k, (fan_in, fan_out), jnp.float32, -bound, bound)

    def bias(k, fan_in, n):
        bound = 1.0 / math.sqrt(fan_in)
        return jax.random.uniform(k, (1, n), jnp.float32, -bound, bound)

    return {
        "wq": xavier(ks[0], input_size, hh), "bq": bias(ks[1], input_size, hh),
        "wk": xavier(ks[2], input_size, hh), "bk": bias(ks[3], input_size, hh),
        "wv": xavier(ks[4], input_size, hh), "bv": bias(ks[5], input_size, hh),
        "wo": xavier(ks[6], hh, output_size), "bo": bias(ks[7], hh, output_size),
        "a1": jnp.ones((1, output_size), jnp.float32),
        "b1": jnp.zeros((1, output_size), jnp.float32),
        "a2": jnp.ones((1, output_size), jnp.float32),
        "b2": jnp.zeros((1, output_size), jnp.float32),
    }


def att_layer_reference(x, pe, params, *, h_num, h_dim):
    """Pure-JAX reference mirroring the PyTorch forward (eval mode)."""
    B, S, D = x.shape
    x = x + pe[None]
    x0 = x
    q = x @ params["wq"] + params["bq"][0]
    k = x @ params["wk"] + params["bk"][0]
    v = jnp.maximum(x @ params["wv"] + params["bv"][0], 0.0)

    def split_heads(t):  # [B,S,H*Hd] -> [B,H,S,Hd]
        return t.reshape(B, S, h_num, h_dim).transpose(0, 2, 1, 3)

    qh, kh, vh = split_heads(q), split_heads(k), split_heads(v)
    scores = jnp.einsum("bhqd,bhkd->bhqk", qh, kh) / math.sqrt(h_dim)
    p = jax.nn.softmax(scores, axis=-1)
    att = jnp.einsum("bhqk,bhkd->bhqd", p, vh)
    att = att.transpose(0, 2, 1, 3).reshape(B, S, h_num * h_dim)

    y = jnp.maximum(att @ params["wo"] + params["bo"][0], 0.0)

    def ln(t, a, b):
        d = t.shape[-1]
        m = t.mean(-1, keepdims=True)
        var = jnp.sum((t - m) ** 2, -1, keepdims=True) / (d - 1)
        return a * (t - m) / (jnp.sqrt(var) + EPS) + b

    y = ln(y, params["a1"][0], params["b1"][0])
    return ln(x0 + y, params["a2"][0], params["b2"][0])


if __name__ == "__main__":
    # small shapes: input_size == output_size (required by the residual add)
    B, S = 2, 8
    input_size = output_size = 32
    h_num, h_dim = 4, 8          # h_num * h_dim == output_size

    key = jax.random.PRNGKey(0)
    kx, kp = jax.random.split(key)
    x = jax.random.normal(kx, (B, S, input_size), jnp.float32)
    pe = make_positional_encoding(S, input_size)
    params = init_params(kp, input_size, output_size, h_num, h_dim)

    ref = att_layer_reference(x, pe, params, h_num=h_num, h_dim=h_dim)

    # f32-operand MXU path (matches the PyTorch module's numerics).
    out = att_layer_pallas(x, pe, params, h_num=h_num, h_dim=h_dim)
    out = jax.block_until_ready(out)
    assert out.shape == (B, S, output_size)
    assert jnp.allclose(out, ref, rtol=5e-3, atol=5e-3), "f32 kernel mismatch"

    # bf16-operand MXU path (per perf review for v5e/v6e/v7x): only matmul
    # operands are cast; softmax / LayerNorm / biases stay f32.
    out_bf16 = att_layer_pallas(x, pe, params, h_num=h_num, h_dim=h_dim,
                                mxu_dtype=jnp.bfloat16)
    out_bf16 = jax.block_until_ready(out_bf16)
    assert jnp.allclose(out_bf16, ref, rtol=1e-1, atol=1e-1), "bf16 kernel mismatch"

    # TODO(synk): dropout layers are identity here (inference); training-mode
    # stochastic dropout would need pltpu.prng_* inside the kernel.
    print("KERNEL_OK")
</pallas_src>

<mosaic_0001>
module attributes {stable_mosaic.version = 11 : i64} {
  func.func @att_layer_kernel(%arg0: i32, %arg1: memref<2x8x32xf32, #tpu.memory_space<vmem>>, %arg2: memref<8x32xf32, #tpu.memory_space<vmem>>, %arg3: memref<32x96xf32, #tpu.memory_space<vmem>>, %arg4: memref<1x96xf32, #tpu.memory_space<vmem>>, %arg5: memref<32x32xf32, #tpu.memory_space<vmem>>, %arg6: memref<1x32xf32, #tpu.memory_space<vmem>>, %arg7: memref<1x32xf32, #tpu.memory_space<vmem>>, %arg8: memref<1x32xf32, #tpu.memory_space<vmem>>, %arg9: memref<1x32xf32, #tpu.memory_space<vmem>>, %arg10: memref<1x32xf32, #tpu.memory_space<vmem>>, %arg11: memref<2x8x32xf32, #tpu.memory_space<vmem>>) attributes {dimension_semantics = [#tpu.dimension_semantics<parallel>], iteration_bounds = array<i64: 1>, scalar_prefetch = 0 : i64, scratch_operands = 0 : i64, tpu.core_type = #tpu.core_type<tc>, window_params = [{transform_indices = @transform_0, window_bounds = array<i64: 2, 8, 32>}, {pipeline_mode = #tpu.pipeline_mode<synchronous>, transform_indices = @transform_1, window_bounds = array<i64: 8, 32>}, {pipeline_mode = #tpu.pipeline_mode<synchronous>, transform_indices = @transform_2, window_bounds = array<i64: 32, 96>}, {pipeline_mode = #tpu.pipeline_mode<synchronous>, transform_indices = @transform_3, window_bounds = array<i64: 1, 96>}, {pipeline_mode = #tpu.pipeline_mode<synchronous>, transform_indices = @transform_4, window_bounds = array<i64: 32, 32>}, {pipeline_mode = #tpu.pipeline_mode<synchronous>, transform_indices = @transform_5, window_bounds = array<i64: 1, 32>}, {pipeline_mode = #tpu.pipeline_mode<synchronous>, transform_indices = @transform_6, window_bounds = array<i64: 1, 32>}, {pipeline_mode = #tpu.pipeline_mode<synchronous>, transform_indices = @transform_7, window_bounds = array<i64: 1, 32>}, {pipeline_mode = #tpu.pipeline_mode<synchronous>, transform_indices = @transform_8, window_bounds = array<i64: 1, 32>}, {pipeline_mode = #tpu.pipeline_mode<synchronous>, transform_indices = @transform_9, window_bounds = array<i64: 1, 32>}, {transform_indices = @transform_10, window_bounds = array<i64: 2, 8, 32>}]} {
    %c0 = arith.constant 0 : index
    %c0_0 = arith.constant 0 : index
    %c0_1 = arith.constant 0 : index
    %0 = vector.load %arg1[%c0, %c0_0, %c0_1] : memref<2x8x32xf32, #tpu.memory_space<vmem>>, vector<2x8x32xf32>
    %c0_2 = arith.constant 0 : index
    %c0_3 = arith.constant 0 : index
    %1 = vector.load %arg2[%c0_2, %c0_3] : memref<8x32xf32, #tpu.memory_space<vmem>>, vector<8x32xf32>
    %2 = vector.shape_cast %1 : vector<8x32xf32> to vector<1x8x32xf32>
    %3 = vector.broadcast %2 : vector<1x8x32xf32> to vector<2x8x32xf32>
    %4 = arith.addf %0, %3 : vector<2x8x32xf32>
    %5 = vector.shape_cast %4 : vector<2x8x32xf32> to vector<16x32xf32>
    %c0_4 = arith.constant 0 : index
    %c0_5 = arith.constant 0 : index
    %6 = vector.load %arg4[%c0_4, %c0_5] : memref<1x96xf32, #tpu.memory_space<vmem>>, vector<1x96xf32>
    %c0_6 = arith.constant 0 : index
    %c0_7 = arith.constant 0 : index
    %7 = vector.load %arg3[%c0_6, %c0_7] : memref<32x96xf32, #tpu.memory_space<vmem>>, vector<32x96xf32>
    %cst = arith.constant dense<0.000000e+00> : vector<16x96xf32>
    %8 = tpu.matmul %5, %7, %cst {dimension_numbers = #tpu.dot_dimension_numbers<[1], [0], [0], [1], [0, 0, 1, 1], [], []>} : vector<16x32xf32>, vector<32x96xf32>, vector<16x96xf32> -> vector<16x96xf32>
    %9 = vector.broadcast %6 : vector<1x96xf32> to vector<16x96xf32>
    %10 = arith.addf %8, %9 : vector<16x96xf32>
    %11 = vector.extract_strided_slice %10 {offsets = [0, 0], sizes = [16, 32], strides = [1, 1]} : vector<16x96xf32> to vector<16x32xf32>
    %12 = vector.shape_cast %11 : vector<16x32xf32> to vector<2x8x32xf32>
    %13 = vector.extract_strided_slice %10 {offsets = [0, 32], sizes = [16, 32], strides = [1, 1]} : vector<16x96xf32> to vector<16x32xf32>
    %14 = vector.shape_cast %13 : vector<16x32xf32> to vector<2x8x32xf32>
    %15 = vector.extract_strided_slice %10 {offsets = [0, 64], sizes = [16, 32], strides = [1, 1]} : vector<16x96xf32> to vector<16x32xf32>
    %cst_8 = arith.constant 0.000000e+00 : f32
    %16 = vector.broadcast %cst_8 : f32 to vector<16x32xf32>
    %17 = arith.maximumf %15, %16 : vector<16x32xf32>
    %18 = vector.shape_cast %17 : vector<16x32xf32> to vector<2x8x32xf32>
    %19 = vector.extract_strided_slice %12 {offsets = [0, 0, 0], sizes = [2, 8, 8], strides = [1, 1, 1]} : vector<2x8x32xf32> to vector<2x8x8xf32>
    %20 = vector.extract_strided_slice %14 {offsets = [0, 0, 0], sizes = [2, 8, 8], strides = [1, 1, 1]} : vector<2x8x32xf32> to vector<2x8x8xf32>
    %21 = vector.extract_strided_slice %18 {offsets = [0, 0, 0], sizes = [2, 8, 8], strides = [1, 1, 1]} : vector<2x8x32xf32> to vector<2x8x8xf32>
    "tpu.trace_start"() <{level = 10 : i32, message = "bqd,bkd->bqk"}> : () -> ()
    %cst_9 = arith.constant dense<0.000000e+00> : vector<2x8x8xf32>
    %22 = tpu.matmul %19, %20, %cst_9 {dimension_numbers = #tpu.dot_dimension_numbers<[2], [2], [1], [1], [0, 0, 0, 1, 1, 1], [0], [0]>} : vector<2x8x8xf32>, vector<2x8x8xf32>, vector<2x8x8xf32> -> vector<2x8x8xf32>
    "tpu.trace_stop"() : () -> ()
    %cst_10 = arith.constant 0.353553385 : f32
    %23 = vector.broadcast %cst_10 : f32 to vector<2x8x8xf32>
    %24 = arith.mulf %22, %23 : vector<2x8x8xf32>
    %cst_11 = arith.constant dense<0xFF800000> : vector<2x8xf32>
    %25 = vector.multi_reduction <maximumf>, %24, %cst_11 [2] : vector<2x8x8xf32> to vector<2x8xf32>
    %26 = vector.shape_cast %25 : vector<2x8xf32> to vector<2x8x1xf32>
    %27 = vector.broadcast %26 : vector<2x8x1xf32> to vector<2x8x8xf32>
    %28 = arith.subf %24, %27 : vector<2x8x8xf32>
    %29 = math.exp %28 : vector<2x8x8xf32>
    %cst_12 = arith.constant dense<0.000000e+00> : vector<2x8xf32>
    %30 = vector.multi_reduction <add>, %29, %cst_12 [2] : vector<2x8x8xf32> to vector<2x8xf32>
    %31 = vector.shape_cast %30 : vector<2x8xf32> to vector<2x8x1xf32>
    %32 = tpu.reciprocal %31 {approx = true} : vector<2x8x1xf32> -> vector<2x8x1xf32>
    %33 = arith.mulf %31, %32 : vector<2x8x1xf32>
    %cst_13 = arith.constant 2.000000e+00 : f32
    %34 = vector.broadcast %cst_13 : f32 to vector<2x8x1xf32>
    %35 = arith.subf %34, %33 : vector<2x8x1xf32>
    %36 = arith.mulf %32, %35 : vector<2x8x1xf32>
    %37 = vector.broadcast %36 : vector<2x8x1xf32> to vector<2x8x8xf32>
    %38 = arith.mulf %29, %37 : vector<2x8x8xf32>
    "tpu.trace_start"() <{level = 10 : i32, message = "bqk,bkd->bqd"}> : () -> ()
    %cst_14 = arith.constant dense<0.000000e+00> : vector<2x8x8xf32>
    %39 = tpu.matmul %38, %21, %cst_14 {dimension_numbers = #tpu.dot_dimension_numbers<[2], [1], [1], [2], [0, 0, 0, 1, 1, 2], [0], [0]>} : vector<2x8x8xf32>, vector<2x8x8xf32>, vector<2x8x8xf32> -> vector<2x8x8xf32>
    "tpu.trace_stop"() : () -> ()
    %40 = vector.shape_cast %39 : vector<2x8x8xf32> to vector<16x8xf32>
    %41 = vector.extract_strided_slice %12 {offsets = [0, 0, 8], sizes = [2, 8, 8], strides = [1, 1, 1]} : vector<2x8x32xf32> to vector<2x8x8xf32>
    %42 = vector.extract_strided_slice %14 {offsets = [0, 0, 8], sizes = [2, 8, 8], strides = [1, 1, 1]} : vector<2x8x32xf32> to vector<2x8x8xf32>
    %43 = vector.extract_strided_slice %18 {offsets = [0, 0, 8], sizes = [2, 8, 8], strides = [1, 1, 1]} : vector<2x8x32xf32> to vector<2x8x8xf32>
    "tpu.trace_start"() <{level = 10 : i32, message = "bqd,bkd->bqk"}> : () -> ()
    %cst_15 = arith.constant dense<0.000000e+00> : vector<2x8x8xf32>
    %44 = tpu.matmul %41, %42, %cst_15 {dimension_numbers = #tpu.dot_dimension_numbers<[2], [2], [1], [1], [0, 0, 0, 1, 1, 1], [0], [0]>} : vector<2x8x8xf32>, vector<2x8x8xf32>, vector<2x8x8xf32> -> vector<2x8x8xf32>
    "tpu.trace_stop"() : () -> ()
    %cst_16 = arith.constant 0.353553385 : f32
    %45 = vector.broadcast %cst_16 : f32 to vector<2x8x8xf32>
    %46 = arith.mulf %44, %45 : vector<2x8x8xf32>
    %cst_17 = arith.constant dense<0xFF800000> : vector<2x8xf32>
    %47 = vector.multi_reduction <maximumf>, %46, %cst_17 [2] : vector<2x8x8xf32> to vector<2x8xf32>
    %48 = vector.shape_cast %47 : vector<2x8xf32> to vector<2x8x1xf32>
    %49 = vector.broadcast %48 : vector<2x8x1xf32> to vector<2x8x8xf32>
    %50 = arith.subf %46, %49 : vector<2x8x8xf32>
    %51 = math.exp %50 : vector<2x8x8xf32>
    %cst_18 = arith.constant dense<0.000000e+00> : vector<2x8xf32>
    %52 = vector.multi_reduction <add>, %51, %cst_18 [2] : vector<2x8x8xf32> to vector<2x8xf32>
    %53 = vector.shape_cast %52 : vector<2x8xf32> to vector<2x8x1xf32>
    %54 = tpu.reciprocal %53 {approx = true} : vector<2x8x1xf32> -> vector<2x8x1xf32>
    %55 = arith.mulf %53, %54 : vector<2x8x1xf32>
    %cst_19 = arith.constant 2.000000e+00 : f32
    %56 = vector.broadcast %cst_19 : f32 to vector<2x8x1xf32>
    %57 = arith.subf %56, %55 : vector<2x8x1xf32>
    %58 = arith.mulf %54, %57 : vector<2x8x1xf32>
    %59 = vector.broadcast %58 : vector<2x8x1xf32> to vector<2x8x8xf32>
    %60 = arith.mulf %51, %59 : vector<2x8x8xf32>
    "tpu.trace_start"() <{level = 10 : i32, message = "bqk,bkd->bqd"}> : () -> ()
    %cst_20 = arith.constant dense<0.000000e+00> : vector<2x8x8xf32>
    %61 = tpu.matmul %60, %43, %cst_20 {dimension_numbers = #tpu.dot_dimension_numbers<[2], [1], [1], [2], [0, 0, 0, 1, 1, 2], [0], [0]>} : vector<2x8x8xf32>, vector<2x8x8xf32>, vector<2x8x8xf32> -> vector<2x8x8xf32>
    "tpu.trace_stop"() : () -> ()
    %62 = vector.shape_cast %61 : vector<2x8x8xf32> to vector<16x8xf32>
    %63 = vector.extract_strided_slice %12 {offsets = [0, 0, 16], sizes = [2, 8, 8], strides = [1, 1, 1]} : vector<2x8x32xf32> to vector<2x8x8xf32>
    %64 = vector.extract_strided_slice %14 {offsets = [0, 0, 16], sizes = [2, 8, 8], strides = [1, 1, 1]} : vector<2x8x32xf32> to vector<2x8x8xf32>
    %65 = vector.extract_strided_slice %18 {offsets = [0, 0, 16], sizes = [2, 8, 8], strides = [1, 1, 1]} : vector<2x8x32xf32> to vector<2x8x8xf32>
    "tpu.trace_start"() <{level = 10 : i32, message = "bqd,bkd->bqk"}> : () -> ()
    %cst_21 = arith.constant dense<0.000000e+00> : vector<2x8x8xf32>
    %66 = tpu.matmul %63, %64, %cst_21 {dimension_numbers = #tpu.dot_dimension_numbers<[2], [2], [1], [1], [0, 0, 0, 1, 1, 1], [0], [0]>} : vector<2x8x8xf32>, vector<2x8x8xf32>, vector<2x8x8xf32> -> vector<2x8x8xf32>
    "tpu.trace_stop"() : () -> ()
    %cst_22 = arith.constant 0.353553385 : f32
    %67 = vector.broadcast %cst_22 : f32 to vector<2x8x8xf32>
    %68 = arith.mulf %66, %67 : vector<2x8x8xf32>
    %cst_23 = arith.constant dense<0xFF800000> : vector<2x8xf32>
    %69 = vector.multi_reduction <maximumf>, %68, %cst_23 [2] : vector<2x8x8xf32> to vector<2x8xf32>
    %70 = vector.shape_cast %69 : vector<2x8xf32> to vector<2x8x1xf32>
    %71 = vector.broadcast %70 : vector<2x8x1xf32> to vector<2x8x8xf32>
    %72 = arith.subf %68, %71 : vector<2x8x8xf32>
    %73 = math.exp %72 : vector<2x8x8xf32>
    %cst_24 = arith.constant dense<0.000000e+00> : vector<2x8xf32>
    %74 = vector.multi_reduction <add>, %73, %cst_24 [2] : vector<2x8x8xf32> to vector<2x8xf32>
    %75 = vector.shape_cast %74 : vector<2x8xf32> to vector<2x8x1xf32>
    %76 = tpu.reciprocal %75 {approx = true} : vector<2x8x1xf32> -> vector<2x8x1xf32>
    %77 = arith.mulf %75, %76 : vector<2x8x1xf32>
    %cst_25 = arith.constant 2.000000e+00 : f32
    %78 = vector.broadcast %cst_25 : f32 to vector<2x8x1xf32>
    %79 = arith.subf %78, %77 : vector<2x8x1xf32>
    %80 = arith.mulf %76, %79 : vector<2x8x1xf32>
    %81 = vector.broadcast %80 : vector<2x8x1xf32> to vector<2x8x8xf32>
    %82 = arith.mulf %73, %81 : vector<2x8x8xf32>
    "tpu.trace_start"() <{level = 10 : i32, message = "bqk,bkd->bqd"}> : () -> ()
    %cst_26 = arith.constant dense<0.000000e+00> : vector<2x8x8xf32>
    %83 = tpu.matmul %82, %65, %cst_26 {dimension_numbers = #tpu.dot_dimension_numbers<[2], [1], [1], [2], [0, 0, 0, 1, 1, 2], [0], [0]>} : vector<2x8x8xf32>, vector<2x8x8xf32>, vector<2x8x8xf32> -> vector<2x8x8xf32>
    "tpu.trace_stop"() : () -> ()
    %84 = vector.shape_cast %83 : vector<2x8x8xf32> to vector<16x8xf32>
    %85 = vector.extract_strided_slice %12 {offsets = [0, 0, 24], sizes = [2, 8, 8], strides = [1, 1, 1]} : vector<2x8x32xf32> to vector<2x8x8xf32>
    %86 = vector.extract_strided_slice %14 {offsets = [0, 0, 24], sizes = [2, 8, 8], strides = [1, 1, 1]} : vector<2x8x32xf32> to vector<2x8x8xf32>
    %87 = vector.extract_strided_slice %18 {offsets = [0, 0, 24], sizes = [2, 8, 8], strides = [1, 1, 1]} : vector<2x8x32xf32> to vector<2x8x8xf32>
    "tpu.trace_start"() <{level = 10 : i32, message = "bqd,bkd->bqk"}> : () -> ()
    %cst_27 = arith.constant dense<0.000000e+00> : vector<2x8x8xf32>
    %88 = tpu.matmul %85, %86, %cst_27 {dimension_numbers = #tpu.dot_dimension_numbers<[2], [2], [1], [1], [0, 0, 0, 1, 1, 1], [0], [0]>} : vector<2x8x8xf32>, vector<2x8x8xf32>, vector<2x8x8xf32> -> vector<2x8x8xf32>
    "tpu.trace_stop"() : () -> ()
    %cst_28 = arith.constant 0.353553385 : f32
    %89 = vector.broadcast %cst_28 : f32 to vector<2x8x8xf32>
    %90 = arith.mulf %88, %89 : vector<2x8x8xf32>
    %cst_29 = arith.constant dense<0xFF800000> : vector<2x8xf32>
    %91 = vector.multi_reduction <maximumf>, %90, %cst_29 [2] : vector<2x8x8xf32> to vector<2x8xf32>
    %92 = vector.shape_cast %91 : vector<2x8xf32> to vector<2x8x1xf32>
    %93 = vector.broadcast %92 : vector<2x8x1xf32> to vector<2x8x8xf32>
    %94 = arith.subf %90, %93 : vector<2x8x8xf32>
    %95 = math.exp %94 : vector<2x8x8xf32>
    %cst_30 = arith.constant dense<0.000000e+00> : vector<2x8xf32>
    %96 = vector.multi_reduction <add>, %95, %cst_30 [2] : vector<2x8x8xf32> to vector<2x8xf32>
    %97 = vector.shape_cast %96 : vector<2x8xf32> to vector<2x8x1xf32>
    %98 = tpu.reciprocal %97 {approx = true} : vector<2x8x1xf32> -> vector<2x8x1xf32>
    %99 = arith.mulf %97, %98 : vector<2x8x1xf32>
    %cst_31 = arith.constant 2.000000e+00 : f32
    %100 = vector.broadcast %cst_31 : f32 to vector<2x8x1xf32>
    %101 = arith.subf %100, %99 : vector<2x8x1xf32>
    %102 = arith.mulf %98, %101 : vector<2x8x1xf32>
    %103 = vector.broadcast %102 : vector<2x8x1xf32> to vector<2x8x8xf32>
    %104 = arith.mulf %95, %103 : vector<2x8x8xf32>
    "tpu.trace_start"() <{level = 10 : i32, message = "bqk,bkd->bqd"}> : () -> ()
    %cst_32 = arith.constant dense<0.000000e+00> : vector<2x8x8xf32>
    %105 = tpu.matmul %104, %87, %cst_32 {dimension_numbers = #tpu.dot_dimension_numbers<[2], [1], [1], [2], [0, 0, 0, 1, 1, 2], [0], [0]>} : vector<2x8x8xf32>, vector<2x8x8xf32>, vector<2x8x8xf32> -> vector<2x8x8xf32>
    "tpu.trace_stop"() : () -> ()
    %106 = vector.shape_cast %105 : vector<2x8x8xf32> to vector<16x8xf32>
    %107 = tpu.concatenate %40, %62, %84, %106 in 1 : vector<16x8xf32>, vector<16x8xf32>, vector<16x8xf32>, vector<16x8xf32> -> vector<16x32xf32>
    %c0_33 = arith.constant 0 : index
    %c0_34 = arith.constant 0 : index
    %108 = vector.load %arg5[%c0_33, %c0_34] : memref<32x32xf32, #tpu.memory_space<vmem>>, vector<32x32xf32>
    %cst_35 = arith.constant dense<0.000000e+00> : vector<16x32xf32>
    %109 = tpu.matmul %107, %108, %cst_35 {dimension_numbers = #tpu.dot_dimension_numbers<[1], [0], [0], [1], [0, 0, 1, 1], [], []>} : vector<16x32xf32>, vector<32x32xf32>, vector<16x32xf32> -> vector<16x32xf32>
    %c0_36 = arith.constant 0 : index
    %c0_37 = arith.constant 0 : index
    %110 = vector.load %arg6[%c0_36, %c0_37] : memref<1x32xf32, #tpu.memory_space<vmem>>, vector<1x32xf32>
    %111 = vector.broadcast %110 : vector<1x32xf32> to vector<16x32xf32>
    %112 = arith.addf %109, %111 : vector<16x32xf32>
    %cst_38 = arith.constant 0.000000e+00 : f32
    %113 = vector.broadcast %cst_38 : f32 to vector<16x32xf32>
    %114 = arith.maximumf %112, %113 : vector<16x32xf32>
    %c0_39 = arith.constant 0 : index
    %c0_40 = arith.constant 0 : index
    %115 = vector.load %arg7[%c0_39, %c0_40] : memref<1x32xf32, #tpu.memory_space<vmem>>, vector<1x32xf32>
    %c0_41 = arith.constant 0 : index
    %c0_42 = arith.constant 0 : index
    %116 = vector.load %arg8[%c0_41, %c0_42] : memref<1x32xf32, #tpu.memory_space<vmem>>, vector<1x32xf32>
    %cst_43 = arith.constant dense<0.000000e+00> : vector<16xf32>
    %117 = vector.multi_reduction <add>, %114, %cst_43 [1] : vector<16x32xf32> to vector<16xf32>
    %118 = vector.shape_cast %117 : vector<16xf32> to vector<16x1xf32>
    %cst_44 = arith.constant 3.200000e+01 : f32
    %119 = vector.broadcast %cst_44 : f32 to vector<16x1xf32>
    %120 = arith.divf %118, %119 : vector<16x1xf32>
    %121 = vector.broadcast %120 : vector<16x1xf32> to vector<16x32xf32>
    %122 = arith.subf %114, %121 : vector<16x32xf32>
    %123 = arith.mulf %122, %122 : vector<16x32xf32>
    %cst_45 = arith.constant dense<0.000000e+00> : vector<16xf32>
    %124 = vector.multi_reduction <add>, %123, %cst_45 [1] : vector<16x32xf32> to vector<16xf32>
    %125 = vector.shape_cast %124 : vector<16xf32> to vector<16x1xf32>
    %cst_46 = arith.constant 0.0322580636 : f32
    %126 = vector.broadcast %cst_46 : f32 to vector<16x1xf32>
    %127 = arith.mulf %125, %126 : vector<16x1xf32>
    %128 = math.sqrt %127 : vector<16x1xf32>
    %cst_47 = arith.constant 9.99999997E-7 : f32
    %129 = vector.broadcast %cst_47 : f32 to vector<16x1xf32>
    %130 = arith.addf %128, %129 : vector<16x1xf32>
    %131 = tpu.reciprocal %130 {approx = true} : vector<16x1xf32> -> vector<16x1xf32>
    %132 = arith.mulf %130, %131 : vector<16x1xf32>
    %cst_48 = arith.constant 2.000000e+00 : f32
    %133 = vector.broadcast %cst_48 : f32 to vector<16x1xf32>
    %134 = arith.subf %133, %132 : vector<16x1xf32>
    %135 = arith.mulf %131, %134 : vector<16x1xf32>
    %136 = vector.broadcast %120 : vector<16x1xf32> to vector<16x32xf32>
    %137 = arith.subf %114, %136 : vector<16x32xf32>
    %138 = vector.broadcast %115 : vector<1x32xf32> to vector<16x32xf32>
    %139 = arith.mulf %138, %137 : vector<16x32xf32>
    %140 = vector.broadcast %135 : vector<16x1xf32> to vector<16x32xf32>
    %141 = arith.mulf %139, %140 : vector<16x32xf32>
    %142 = vector.broadcast %116 : vector<1x32xf32> to vector<16x32xf32>
    %143 = arith.addf %141, %142 : vector<16x32xf32>
    %144 = arith.addf %5, %143 : vector<16x32xf32>
    %c0_49 = arith.constant 0 : index
    %c0_50 = arith.constant 0 : index
    %145 = vector.load %arg9[%c0_49, %c0_50] : memref<1x32xf32, #tpu.memory_space<vmem>>, vector<1x32xf32>
    %c0_51 = arith.constant 0 : index
    %c0_52 = arith.constant 0 : index
    %146 = vector.load %arg10[%c0_51, %c0_52] : memref<1x32xf32, #tpu.memory_space<vmem>>, vector<1x32xf32>
    %cst_53 = arith.constant dense<0.000000e+00> : vector<16xf32>
    %147 = vector.multi_reduction <add>, %144, %cst_53 [1] : vector<16x32xf32> to vector<16xf32>
    %148 = vector.shape_cast %147 : vector<16xf32> to vector<16x1xf32>
    %cst_54 = arith.constant 3.200000e+01 : f32
    %149 = vector.broadcast %cst_54 : f32 to vector<16x1xf32>
    %150 = arith.divf %148, %149 : vector<16x1xf32>
    %151 = vector.broadcast %150 : vector<16x1xf32> to vector<16x32xf32>
    %152 = arith.subf %144, %151 : vector<16x32xf32>
    %153 = arith.mulf %152, %152 : vector<16x32xf32>
    %cst_55 = arith.constant dense<0.000000e+00> : vector<16xf32>
    %154 = vector.multi_reduction <add>, %153, %cst_55 [1] : vector<16x32xf32> to vector<16xf32>
    %155 = vector.shape_cast %154 : vector<16xf32> to vector<16x1xf32>
    %cst_56 = arith.constant 0.0322580636 : f32
    %156 = vector.broadcast %cst_56 : f32 to vector<16x1xf32>
    %157 = arith.mulf %155, %156 : vector<16x1xf32>
    %158 = math.sqrt %157 : vector<16x1xf32>
    %cst_57 = arith.constant 9.99999997E-7 : f32
    %159 = vector.broadcast %cst_57 : f32 to vector<16x1xf32>
    %160 = arith.addf %158, %159 : vector<16x1xf32>
    %161 = tpu.reciprocal %160 {approx = true} : vector<16x1xf32> -> vector<16x1xf32>
    %162 = arith.mulf %160, %161 : vector<16x1xf32>
    %cst_58 = arith.constant 2.000000e+00 : f32
    %163 = vector.broadcast %cst_58 : f32 to vector<16x1xf32>
    %164 = arith.subf %163, %162 : vector<16x1xf32>
    %165 = arith.mulf %161, %164 : vector<16x1xf32>
    %166 = vector.broadcast %150 : vector<16x1xf32> to vector<16x32xf32>
    %167 = arith.subf %144, %166 : vector<16x32xf32>
    %168 = vector.broadcast %145 : vector<1x32xf32> to vector<16x32xf32>
    %169 = arith.mulf %168, %167 : vector<16x32xf32>
    %170 = vector.broadcast %165 : vector<16x1xf32> to vector<16x32xf32>
    %171 = arith.mulf %169, %170 : vector<16x32xf32>
    %172 = vector.broadcast %146 : vector<1x32xf32> to vector<16x32xf32>
    %173 = arith.addf %171, %172 : vector<16x32xf32>
    %174 = vector.shape_cast %173 : vector<16x32xf32> to vector<2x8x32xf32>
    %c0_59 = arith.constant 0 : index
    %c0_60 = arith.constant 0 : index
    %c0_61 = arith.constant 0 : index
    %175 = vector.load %arg11[%c0_59, %c0_60, %c0_61] : memref<2x8x32xf32, #tpu.memory_space<vmem>>, vector<2x8x32xf32>
    tpu.vector_store %arg11[%c0_59, %c0_60, %c0_61], %174 {strides = array<i32>} : memref<2x8x32xf32, #tpu.memory_space<vmem>>, vector<2x8x32xf32>,
    return
  }
  func.func @transform_0(%arg0: i32) -> (i32, i32, i32) {
    %c0_i32 = arith.constant 0 : i32
    %c0_i32_0 = arith.constant 0 : i32
    %c0_i32_1 = arith.constant 0 : i32
    return %arg0, %c0_i32, %c0_i32_0 : i32, i32, i32
  }
  func.func @transform_1(%arg0: i32) -> (i32, i32) {
    %c0_i32 = arith.constant 0 : i32
    %c0_i32_0 = arith.constant 0 : i32
    %c0_i32_1 = arith.constant 0 : i32
    return %c0_i32, %c0_i32_0 : i32, i32
  }
  func.func @transform_2(%arg0: i32) -> (i32, i32) {
    %c0_i32 = arith.constant 0 : i32
    %c0_i32_0 = arith.constant 0 : i32
    %c0_i32_1 = arith.constant 0 : i32
    return %c0_i32, %c0_i32_0 : i32, i32
  }
  func.func @transform_3(%arg0: i32) -> (i32, i32) {
    %c0_i32 = arith.constant 0 : i32
    %c0_i32_0 = arith.constant 0 : i32
    %c0_i32_1 = arith.constant 0 : i32
    return %c0_i32, %c0_i32_0 : i32, i32
  }
  func.func @transform_4(%arg0: i32) -> (i32, i32) {
    %c0_i32 = arith.constant 0 : i32
    %c0_i32_0 = arith.constant 0 : i32
    %c0_i32_1 = arith.constant 0 : i32
    return %c0_i32, %c0_i32_0 : i32, i32
  }
  func.func @transform_5(%arg0: i32) -> (i32, i32) {
    %c0_i32 = arith.constant 0 : i32
    %c0_i32_0 = arith.constant 0 : i32
    %c0_i32_1 = arith.constant 0 : i32
    return %c0_i32, %c0_i32_0 : i32, i32
  }
  func.func @transform_6(%arg0: i32) -> (i32, i32) {
    %c0_i32 = arith.constant 0 : i32
    %c0_i32_0 = arith.constant 0 : i32
    %c0_i32_1 = arith.constant 0 : i32
    return %c0_i32, %c0_i32_0 : i32, i32
  }
  func.func @transform_7(%arg0: i32) -> (i32, i32) {
    %c0_i32 = arith.constant 0 : i32
    %c0_i32_0 = arith.constant 0 : i32
    %c0_i32_1 = arith.constant 0 : i32
    return %c0_i32, %c0_i32_0 : i32, i32
  }
  func.func @transform_8(%arg0: i32) -> (i32, i32) {
    %c0_i32 = arith.constant 0 : i32
    %c0_i32_0 = arith.constant 0 : i32
    %c0_i32_1 = arith.constant 0 : i32
    return %c0_i32, %c0_i32_0 : i32, i32
  }
  func.func @transform_9(%arg0: i32) -> (i32, i32) {
    %c0_i32 = arith.constant 0 : i32
    %c0_i32_0 = arith.constant 0 : i32
    %c0_i32_1 = arith.constant 0 : i32
    return %c0_i32, %c0_i32_0 : i32, i32
  }
  func.func @transform_10(%arg0: i32) -> (i32, i32, i32) {
    %c0_i32 = arith.constant 0 : i32
    %c0_i32_0 = arith.constant 0 : i32
    %c0_i32_1 = arith.constant 0 : i32
    return %arg0, %c0_i32, %c0_i32_0 : i32, i32, i32
  }
}

</mosaic_0001>

<bundles_post_ra>
// kernel: tpu_custom_call.1
= control target key start
LH: loop header
LB: loop body
LE: loop exit
PB: predicated region body
PF: predicated region fallthrough
CT: control target
= control target key end

     0   :  { %15 = vsyncpa [#allocation3], 0  ;;  %s2460_s0 = inlined_call_operand.hbm [shape: f32[2,8,32], index: 0, kind: input, shape index: {}]   ;;  %s2461_s1 = inlined_call_operand.hbm [shape: f32[8,32], index: 1, kind: input, shape index: {}]   ;;  %s2462_s2 = inlined_call_operand.hbm [shape: f32[32,96], index: 2, kind: input, shape index: {}]   ;;  %s2463_s3 = inlined_call_operand.vmem [shape: f32[1,96], index: 3, kind: input, shape index: {}]   ;;  %s2464_s4 = inlined_call_operand.hbm [shape: f32[32,32], index: 4, kind: input, shape index: {}]   ;;  %s2465_s5 = inlined_call_operand.vmem [shape: f32[1,32], index: 5, kind: input, shape index: {}]   ;;  %s2466_s6 = inlined_call_operand.vmem [shape: f32[1,32], index: 6, kind: input, shape index: {}]   ;;  %s2467_s7 = inlined_call_operand.vmem [shape: f32[1,32], index: 7, kind: input, shape index: {}]   ;;  %s2468_s8 = inlined_call_operand.vmem [shape: f32[1,32], index: 8, kind: input, shape index: {}]   ;;  %s2469_s9 = inlined_call_operand.vmem [shape: f32[1,32], index: 9, kind: input, shape index: {}]   ;;  %s2470_s10 = inlined_call_operand.hbm [shape: f32[2,8,32], index: 10, kind: output, shape index: {}]  }
   0x1   :  { %16 = vsyncpa [#allocation6], 0 }
   0x2   :  { %17 = vsyncpa [#allocation9], 0 }
   0x3   :  { %18 = vsyncpa [#allocation4], 0  ;;  %s2178_s13 = smov [#allocation5]   ;;  %s2179_s15 = smov [#allocation2]  }
   0x4   :  { %s37_s14 = sshll.u32 %s2178_s13, 4  ;;  %s24_s16 = sshll.u32 %s2179_s15, 4  ;;  %s38_s14 = int_to_ptr.vmem [resolvable:$true] %s37_s14  ;;  %s25_s16 = int_to_ptr.vmem [resolvable:$true] %s24_s16 }
   0x5   :  { %s2078_s17 = scalar_lea.vmem %s38_s14, 128  ;;  %p2083_p1 = scmp.lt.s32.totalorder %s38_s14, %s38_s14 }
   0x6   :  { %p2079_p0 = scmp.ne.s32.totalorder %s38_s14, %s2078_s17  ;;  %p2084_p2 = scmp.lt.s32.totalorder %s2078_s17, %s2078_s17 }
   0x8   :  { %p2085_p3 = por %p2084_p2, %p2083_p1 }
   0xa   :  { %p2086_p4 = pnand %p2085_p3, %p2079_p0 }
   0xc   :  { %2089 = shalt.err (!%p2086_p4)
}
   0xd   :  { %40 = dma.hbm_to_vmem [thread:$0]  %s2461_s1, 128, %s38_s14, [#allocation6]  }
   0xe   :  { %s2098_s20 = scalar_lea.vmem %s25_s16, 256  ;;  %p2103_p6 = scmp.lt.s32.totalorder %s25_s16, %s25_s16 }
   0xf   :  { %p2099_p5 = scmp.ne.s32.totalorder %s25_s16, %s2098_s20  ;;  %p2104_p7 = scmp.lt.s32.totalorder %s2098_s20, %s2098_s20 }
  0x11   :  { %p2105_p8 = por %p2104_p7, %p2103_p6 }
  0x13   :  { %p2106_p9 = pnand %p2105_p8, %p2099_p5 }
  0x15   :  { %2109 = shalt.err (!%p2106_p9)
}
  0x16   :  { %s2180_s21 = smov 128   ;;  %s2181_s22 = smov 8  }
  0x17   :  { %30 = dma.hbm_to_vmem [thread:$0]  %s2460_s0, 256, %s25_s16, [#allocation3], %s2180_s21, %s2180_s21, %s2181_s22  }
  0x18   :  { %s2182_s25 = smov [#allocation7]   ;;  %s2183_s27 = smov [#allocation8]  }
  0x19   :  { %s46_s26 = sshll.u32 %s2182_s25, 4  ;;  %s60_s1 = sshll.u32 %s2183_s27, 4  ;;  %s47_s26 = int_to_ptr.vmem [resolvable:$true] %s46_s26  ;;  %s61_s1 = int_to_ptr.vmem [resolvable:$true] %s60_s1 }
  0x1a   :  { %s2118_s28 = scalar_lea.vmem %s47_s26, 512  ;;  %p2123_p11 = scmp.lt.s32.totalorder %s47_s26, %s47_s26 }
  0x1b   :  { %p2119_p10 = scmp.ne.s32.totalorder %s47_s26, %s2118_s28  ;;  %p2124_p12 = scmp.lt.s32.totalorder %s2118_s28, %s2118_s28 }
  0x1d   :  { %p2125_p13 = por %p2124_p12, %p2123_p11 }
  0x1f   :  { %p2126_p0 = pnand %p2125_p13, %p2119_p10 }
  0x21   :  { %2129 = shalt.err (!%p2126_p0)
}
  0x22   :  { %52 = dma.hbm_to_vmem [thread:$0]  %s2462_s2, 512, %s47_s26, [#allocation6], %s2180_s21, %s2180_s21, %s2181_s22  }
  0x23   :  { %s2138_s0 = scalar_lea.vmem %s61_s1, 512  ;;  %p2143_p2 = scmp.lt.s32.totalorder %s61_s1, %s61_s1 }
  0x24   :  { %p2139_p1 = scmp.ne.s32.totalorder %s61_s1, %s2138_s0  ;;  %p2144_p3 = scmp.lt.s32.totalorder %s2138_s0, %s2138_s0 }
  0x26   :  { %p2145_p4 = por %p2144_p3, %p2143_p2 }
  0x28   :  { %p2146_p5 = pnand %p2145_p4, %p2139_p1 }
  0x2a   :  { %2149 = shalt.err (!%p2146_p5)
}
  0x2b   :  { %66 = dma.hbm_to_vmem [thread:$0]  %s2464_s4, 512, %s61_s1, [#allocation9], %s2180_s21, %s2180_s21, %s2181_s22  }
  0x2c   :  { %2170 = dma.done.wait [#allocation3], 256  }
  0x2d   :  { %2171 = vsyncadd [#allocation3], 4294967040 }
  0x2e   :  { %2172 = dma.done.wait [#allocation6], 640  }
  0x2f   :  { %2173 = vsyncadd [#allocation6], 4294966656 }
  0x30   :  { %2174 = dma.done.wait [#allocation9], 512  }
  0x31   :  { %2175 = vsyncadd [#allocation9], 4294966784  ;;  %v98_v0 = vld [vmem:[#allocation7 + $0x18] sm:$0xff]  ;;  %v97_v1 = vld [vmem:[#allocation7 + $0x10] sm:$0xff]  ;;  %vm105_vm0 = vcmask 261120   ;;  %v2184_v9 = vmov 0.0  }
  0x32   :  { %1898 = vmatprep.subr.mxu0 %v98_v0  ;;  %v89_v2 = vld [vmem:[#allocation2] sm:$0xff]  ;;  %v90_v4 = vld [vmem:[#allocation2 + $0x8] sm:$0xff]  ;;  %v91_v5 = vld [vmem:[#allocation5] sm:$0xff]  ;;  %1909 = vmatprep.subr.mxu1 %v2184_v9  ;;  %vm2185_vm1 = vmmov 0   ;;  %s2186_s13 = smov 96   ;;  %vm192_vm2 = vcmask 64512  }
  0x33   :  { %1899 = vmatpush3.msra.mxu0 %v98_v0  ;;  %v96_v3 = vld [vmem:[#allocation7 + $0x8] sm:$0xff]  ;;  %v2276_v6 = vadd.f32 %v91_v5, %v89_v2  ;;  %v95_v7 = vld [vmem:[#allocation7] sm:$0xff]  ;;  %v2278_v8 = vadd.f32 %v91_v5, %v90_v4  ;;  %1911 = vmatprep.mubr.msk.f32.mxu1 %vm2185_vm1, %v2184_v9  ;;  %s2188_s14 = smov 88   ;;  %s2189_s15 = smov 120   ;;  %vm1571_vm3 = vcmask 195584   ;;  %vm1568_vm4 = vcmask 130048  }
  0x34   :  { %1900 = vmatprep.subr.mxu0 %v97_v1  ;;  %v1820_v11 = vld [vmem:[%s2463_s3] ss:$0 sm:$0xff]  ;;  %s2187_s3 = smov 64   ;;  %s2190_s16 = smov 56  }
  0x35   :  { %1901 = vmatpush3.msra.mxu0 %v97_v1  ;;  %1906 = vmatprep.mubr.msk.f32.mxu0 %vm105_vm0, %v2276_v6  ;;  %s2191_s17 = smov 112   ;;  %s2192_s18 = smov 80  }
  0x36   :  { %1902 = vmatprep.subr.mxu0 %v96_v3  ;;  %s2193_s19 = smov 48   ;;  %s2194_s20 = smov 72  }
  0x37   :  { %1903 = vmatpush3.msra.mxu0 %v96_v3  ;;  %s2195_s23 = smov 104   ;;  %s2196_s24 = smov 40  }
  0x38   :  { %1904 = vmatprep.subr.mxu0 %v95_v7  ;;  %s2197_s25 = smov 16   ;;  %s2198_s26 = smov 24  }
  0x39   :  { %1905 = vmatpush3.msra.mxu0 %v95_v7  ;;  %s2199_s12 = smov [#allocation10]  }
  0x3a   :  { %1907 = vmatmul.mubr.msk.f32.vlgmr.msra.gmra.mxu0 %vm105_vm0, %v2278_v8  ;;  %1929 = vmatprep.subr.mxu0 %v2184_v9  ;;  %s1806_s2 = sshll.u32 %s2199_s12, 4  ;;  %s1807_s2 = int_to_ptr.vmem [resolvable:$true] %s1806_s2 }
  0x3b   :  { %1931 = vmatprep.mubr.msk.f32.mxu0 %vm2185_vm1, %v2184_v9  ;;  %p2155_p7 = scmp.lt.s32.totalorder %s1807_s2, %s1807_s2 }
  0xfa   :  { %v1908_v10 = vpop.f32.mrf.mxu0 }
  0xfb   :  { %v2296_v14 = vadd.f32 %v1908_v10, %v1820_v11 }
  0xfc   :  { %v178_v12 = vpop.f32.mrf.mxu0 }
  0xfd   :  { %v2293_v13 = vadd.f32 %v1820_v11, %v178_v12  ;;  %v2318_v26 = vmax.f32 %v2296_v14, 0.0 }
  0xff   :  { %190 = vrot.lane.b32.xlu0 %v2293_v13, %s2186_s13  ;;  %v2314_v25 = vmax.f32 %v2293_v13, 0.0 }
 0x103   :  { %268 = vrot.lane.b32.xlu0 %v2296_v14, %s2186_s13 }
 0x171   :  { %v191_v15 = vpop.permute.xlu0 %190 }
 0x172   :  { %1910 = vmatpush3.xpose.msk.msra.mxu1 %vm192_vm2, %v191_v15 }
 0x173   :  { %1914 = vmatprep.subr.mxu1 %v2184_v9 }
 0x175   :  { %1912 = vmatmul.mubr.msk.f32.vlgmr.msra.gmra.mxu1 %vm192_vm2, %v2293_v13  ;;  %v269_v16 = vpop.permute.xlu0 %268 }
 0x176   :  { %1915 = vmatpush3.xpose.msk.msra.mxu1 %vm192_vm2, %v269_v16  ;;  %1916 = vmatprep.mubr.msk.f32.mxu1 %vm2185_vm1, %v2184_v9 }
 0x177   :  { %1919 = vmatprep.subr.mxu1 %v2184_v9 }
 0x179   :  { %1917 = vmatmul.mubr.msk.f32.vlgmr.msra.gmra.mxu1 %vm192_vm2, %v2296_v14 }
 0x17a   :  { %1921 = vmatprep.mubr.msk.f32.mxu1 %vm2185_vm1, %v2184_v9 }
 0x235   :  { %v263_v17 = vpop.f32.mrf.mxu1 }
 0x236   :  { %v344_v18 = vmul.f32 0.35355338, %v263_v17 }
 0x237   :  { %v1913_v19 = vpop.f32.mrf.mxu1 }
 0x238   :  { %v346_v20 = vsel %vm192_vm2, %v344_v18, -inf }
 0x239   :  { %347 = vmax.xlane.f32.xlu1 %v346_v20  ;;  %v340_v21 = vpop.f32.mrf.mxu1 }
 0x23a   :  { %v345_v22 = vmul.f32 0.35355338, %v340_v21 }
 0x23b   :  { %v1918_v23 = vpop.f32.mrf.mxu1 }
 0x23c   :  { %v349_v24 = vsel %vm192_vm2, %v345_v22, -inf }
 0x23d   :  { %350 = vmax.xlane.f32.xlu1 %v349_v24 }
 0x24e   :  { %375 = vrot.lane.b32.xlu1 %v2314_v25, %s2187_s3 }
 0x252   :  { %452 = vrot.lane.b32.xlu1 %v2318_v26, %s2187_s3 }
 0x256   :  { %530 = vrot.lane.b32.xlu1 %v2293_v13, %s2188_s14 }
 0x2c2   :  { %v348_v27 = vpop.xlane.xlu1 %347 }
 0x2c3   :  { %v352_v28 = vsub.f32 %v344_v18, %v348_v27 }
 0x2c5   :  { %v354_v29 = vmul.f32 1.442695, %v352_v28 }
 0x2c6   :  { %v351_v30 = vpop.xlane.xlu1 %350 }
 0x2c7   :  { %2022 = vpow2.f32 %v354_v29  ;;  %v353_v31 = vsub.f32 %v345_v22, %v351_v30 }
 0x2c9   :  { %v356_v32 = vmul.f32 1.442695, %v353_v31 }
 0x2ca   :  { %v376_v33 = vpop.permute.xlu1 %375 }
 0x2cb   :  { %2024 = vpow2.f32 %v356_v32  ;;  %1920 = vmatpush3.msra.mxu1 %v376_v33 }
 0x2cc   :  { %1924 = vmatprep.subr.mxu1 %v2184_v9 }
 0x2ce   :  { %v453_v34 = vpop.permute.xlu1 %452 }
 0x2d2   :  { %v531_v35 = vpop.permute.xlu1 %530 }
 0x2d3   :  { %1930 = vmatpush3.xpose.msk.msra.mxu0 %vm192_vm2, %v531_v35 }
 0x2d4   :  { %v2023_v36 = vpop.eup %2022  ;;  %1939 = vmatprep.subr.mxu0 %v2184_v9 }
 0x2d5   :  { %v358_v37 = vsel %vm192_vm2, %v2023_v36, 0.0 }
 0x2d6   :  { %359 = vadd.xlane.f32.xlu0 %v358_v37 }
 0x2d8   :  { %v2025_v38 = vpop.eup %2024 }
 0x2d9   :  { %v361_v39 = vsel %vm192_vm2, %v2025_v38, 0.0 }
 0x2da   :  { %362 = vadd.xlane.f32.xlu1 %v361_v39 }
 0x2eb   :  { %608 = vrot.lane.b32.xlu1 %v2296_v14, %s2188_s14 }
 0x2ec   :  { %528 = vrot.lane.b32.xlu0 %v2293_v13, %s2189_s15 }
 0x2ef   :  { %606 = vrot.lane.b32.xlu1 %v2296_v14, %s2189_s15 }
 0x35f   :  { %v360_v40 = vpop.xlane.xlu0 %359 }
 0x360   :  { %2026 = vrcp.f32 %v360_v40 }
 0x363   :  { %v529_v41 = vpop.permute.xlu0 %528  ;;  %v363_v42 = vpop.xlane.xlu1 %362 }
 0x364   :  { %2028 = vrcp.f32 %v363_v42  ;;  %1932 = vmatmul.mubr.msk.f32.vlgmr.msra.gmra.mxu0 %vm192_vm2, %v529_v41 }
 0x365   :  { %1941 = vmatprep.mubr.msk.f32.mxu0 %vm2185_vm1, %v2184_v9 }
 0x367   :  { %v609_v52 = vpop.permute.xlu1 %608 }
 0x36b   :  { %v607_v54 = vpop.permute.xlu1 %606 }
 0x36d   :  { %v2027_v43 = vpop.eup %2026 }
 0x36e   :  { %v366_v44 = vmul.f32 %v2027_v43, %v360_v40 }
 0x370   :  { %v368_v45 = vsub.f32 2.0, %v366_v44 }
 0x371   :  { %v2029_v46 = vpop.eup %2028 }
 0x372   :  { %v370_v47 = vmul.f32 %v2027_v43, %v368_v45  ;;  %v367_v48 = vmul.f32 %v2029_v46, %v363_v42 }
 0x374   :  { %v372_v49 = vmul.f32 %v2023_v36, %v370_v47  ;;  %v369_v50 = vsub.f32 2.0, %v367_v48 }
 0x376   :  { %v371_v51 = vmul.f32 %v2029_v46, %v369_v50  ;;  %1922 = vmatmul.mubr.msk.f32.vlgmr.msra.gmra.mxu1 %vm192_vm2, %v372_v49 }
 0x377   :  { %1925 = vmatpush3.msra.mxu1 %v453_v34  ;;  %1926 = vmatprep.mubr.msk.f32.mxu1 %vm2185_vm1, %v2184_v9 }
 0x378   :  { %v373_v53 = vmul.f32 %v2025_v38, %v371_v51  ;;  %1934 = vmatprep.subr.mxu1 %v2184_v9 }
 0x37a   :  { %1927 = vmatmul.mubr.msk.f32.vlgmr.msra.gmra.mxu1 %vm192_vm2, %v373_v53 }
 0x37b   :  { %1935 = vmatpush3.xpose.msk.msra.mxu1 %vm192_vm2, %v609_v52  ;;  %1936 = vmatprep.mubr.msk.f32.mxu1 %vm2185_vm1, %v2184_v9 }
 0x37c   :  { %1944 = vmatprep.subr.mxu1 %v2184_v9 }
 0x37e   :  { %1937 = vmatmul.mubr.msk.f32.vlgmr.msra.gmra.mxu1 %vm192_vm2, %v607_v54 }
 0x37f   :  { %1946 = vmatprep.mubr.msk.f32.mxu1 %vm2185_vm1, %v2184_v9 }
 0x424   :  { %v602_v55 = vpop.f32.mrf.mxu0 }
 0x425   :  { %v684_v56 = vmul.f32 0.35355338, %v602_v55 }
 0x426   :  { %v1933_v57 = vpop.f32.mrf.mxu0 }
 0x427   :  { %v686_v58 = vsel %vm192_vm2, %v684_v56, -inf }
 0x428   :  { %687 = vmax.xlane.f32.xlu1 %v686_v58 }
 0x436   :  { %v2346_v59 = vpop.f32.mrf.mxu1 }
 0x438   :  { %v1923_v60 = vpop.f32.mrf.mxu1 }
 0x43a   :  { %v2348_v61 = vpop.f32.mrf.mxu1 }
 0x43c   :  { %v1928_v62 = vpop.f32.mrf.mxu1 }
 0x43e   :  { %v680_v63 = vpop.f32.mrf.mxu1 }
 0x43f   :  { %v685_v0 = vmul.f32 0.35355338, %v680_v63 }
 0x440   :  { %v1938_v1 = vpop.f32.mrf.mxu1 }
 0x441   :  { %v689_v2 = vsel %vm192_vm2, %v685_v0, -inf }
 0x442   :  { %690 = vmax.xlane.f32.xlu0 %v689_v2 }
 0x458   :  { %790 = vrot.lane.b32.xlu0 %v2318_v26, %s2190_s16 }
 0x45c   :  { %866 = vrot.lane.b32.xlu0 %v2293_v13, %s2191_s17 }
 0x4b1   :  { %v688_v3 = vpop.xlane.xlu1 %687 }
 0x4b2   :  { %v692_v4 = vsub.f32 %v684_v56, %v688_v3 }
 0x4b4   :  { %v694_v5 = vmul.f32 1.442695, %v692_v4 }
 0x4b6   :  { %2030 = vpow2.f32 %v694_v5 }
 0x4c3   :  { %v2031_v7 = vpop.eup %2030 }
 0x4c4   :  { %v698_v10 = vsel %vm192_vm2, %v2031_v7, 0.0 }
 0x4c5   :  { %699 = vadd.xlane.f32.xlu1 %v698_v10 }
 0x4cb   :  { %v691_v11 = vpop.xlane.xlu0 %690 }
 0x4cc   :  { %v693_v15 = vsub.f32 %v685_v0, %v691_v11 }
 0x4ce   :  { %v696_v16 = vmul.f32 1.442695, %v693_v15 }
 0x4cf   :  { %v791_v12 = vpop.permute.xlu0 %790 }
 0x4d0   :  { %1945 = vmatpush3.msra.mxu1 %v791_v12  ;;  %2032 = vpow2.f32 %v696_v16 }
 0x4d1   :  { %1954 = vmatprep.subr.mxu1 %v2184_v9 }
 0x4d3   :  { %v867_v29 = vpop.permute.xlu0 %866 }
 0x4d6   :  { %714 = vrot.lane.b32.xlu1 %v2314_v25, %s2190_s16 }
 0x4da   :  { %868 = vrot.lane.b32.xlu1 %v2293_v13, %s2192_s18 }
 0x4dd   :  { %v2033_v17 = vpop.eup %2032 }
 0x4de   :  { %v701_v18 = vsel %vm192_vm2, %v2033_v17, 0.0 }
 0x4fe   :  { %702 = vadd.xlane.f32.xlu1 %v701_v18 }
 0x50f   :  { %946 = vrot.lane.b32.xlu1 %v2296_v14, %s2192_s18 }
 0x513   :  { %944 = vrot.lane.b32.xlu1 %v2296_v14, %s2191_s17 }
 0x54e   :  { %v700_v19 = vpop.xlane.xlu1 %699 }
 0x54f   :  { %2034 = vrcp.f32 %v700_v19 }
 0x552   :  { %v715_v20 = vpop.permute.xlu1 %714 }
 0x553   :  { %1940 = vmatpush3.msra.mxu0 %v715_v20 }
 0x554   :  { %1949 = vmatprep.subr.mxu0 %v2184_v9 }
 0x556   :  { %v869_v28 = vpop.permute.xlu1 %868 }
 0x55c   :  { %v2035_v21 = vpop.eup %2034 }
 0x55d   :  { %v706_v22 = vmul.f32 %v2035_v21, %v700_v19 }
 0x55f   :  { %v708_v23 = vsub.f32 2.0, %v706_v22 }
 0x561   :  { %v710_v24 = vmul.f32 %v2035_v21, %v708_v23 }
 0x563   :  { %v712_v27 = vmul.f32 %v2031_v7, %v710_v24 }
 0x565   :  { %1942 = vmatmul.mubr.msk.f32.vlgmr.msra.gmra.mxu0 %vm192_vm2, %v712_v27 }
 0x566   :  { %1950 = vmatpush3.xpose.msk.msra.mxu0 %vm192_vm2, %v869_v28  ;;  %1951 = vmatprep.mubr.msk.f32.mxu0 %vm2185_vm1, %v2184_v9 }
 0x567   :  { %1959 = vmatprep.subr.mxu0 %v2184_v9 }
 0x569   :  { %1952 = vmatmul.mubr.msk.f32.vlgmr.msra.gmra.mxu0 %vm192_vm2, %v867_v29 }
 0x56a   :  { %1961 = vmatprep.mubr.msk.f32.mxu0 %vm2185_vm1, %v2184_v9 }
 0x587   :  { %v703_v30 = vpop.xlane.xlu1 %702 }
 0x588   :  { %2036 = vrcp.f32 %v703_v30 }
 0x58b   :  { %v947_v35 = vpop.permute.xlu1 %946 }
 0x58f   :  { %v945_v37 = vpop.permute.xlu1 %944 }
 0x595   :  { %v2037_v31 = vpop.eup %2036 }
 0x596   :  { %v707_v32 = vmul.f32 %v2037_v31, %v703_v30 }
 0x598   :  { %v709_v33 = vsub.f32 2.0, %v707_v32 }
 0x59a   :  { %v711_v34 = vmul.f32 %v2037_v31, %v709_v33 }
 0x59c   :  { %v713_v36 = vmul.f32 %v2033_v17, %v711_v34 }
 0x59e   :  { %1947 = vmatmul.mubr.msk.f32.vlgmr.msra.gmra.mxu1 %vm192_vm2, %v713_v36 }
 0x59f   :  { %1955 = vmatpush3.xpose.msk.msra.mxu1 %vm192_vm2, %v947_v35  ;;  %1956 = vmatprep.mubr.msk.f32.mxu1 %vm2185_vm1, %v2184_v9 }
 0x5a0   :  { %1964 = vmatprep.subr.mxu1 %v2184_v9 }
 0x5a2   :  { %1957 = vmatmul.mubr.msk.f32.vlgmr.msra.gmra.mxu1 %vm192_vm2, %v945_v37 }
 0x5a3   :  { %1966 = vmatprep.mubr.msk.f32.mxu1 %vm2185_vm1, %v2184_v9 }
 0x625   :  { %v2377_v38 = vpop.f32.mrf.mxu0 }
 0x627   :  { %v1943_v39 = vpop.f32.mrf.mxu0 }
 0x629   :  { %v940_v40 = vpop.f32.mrf.mxu0 }
 0x62a   :  { %v1022_v41 = vmul.f32 0.35355338, %v940_v40 }
 0x62b   :  { %v1953_v42 = vpop.f32.mrf.mxu0 }
 0x62c   :  { %v1024_v43 = vsel %vm192_vm2, %v1022_v41, -inf }
 0x62d   :  { %1025 = vmax.xlane.f32.xlu0 %v1024_v43 }
 0x65e   :  { %v2380_v44 = vpop.f32.mrf.mxu1 }
 0x660   :  { %v1948_v45 = vpop.f32.mrf.mxu1 }
 0x662   :  { %v1018_v46 = vpop.f32.mrf.mxu1 }
 0x663   :  { %v1023_v47 = vmul.f32 0.35355338, %v1018_v46 }
 0x664   :  { %v1958_v48 = vpop.f32.mrf.mxu1 }
 0x665   :  { %v1027_v49 = vsel %vm192_vm2, %v1023_v47, -inf }
 0x666   :  { %1028 = vmax.xlane.f32.xlu1 %v1027_v49 }
 0x677   :  { %1052 = vrot.lane.b32.xlu1 %v2314_v25, %s2193_s19 }
 0x67b   :  { %1206 = vrot.lane.b32.xlu1 %v2293_v13, %s2194_s20 }
 0x67f   :  { %1284 = vrot.lane.b32.xlu1 %v2296_v14, %s2194_s20 }
 0x683   :  { %1282 = vrot.lane.b32.xlu1 %v2296_v14, %s2195_s23 }
 0x6b6   :  { %v1026_v50 = vpop.xlane.xlu0 %1025 }
 0x6b7   :  { %v1030_v51 = vsub.f32 %v1022_v41, %v1026_v50 }
 0x6b9   :  { %v1032_v52 = vmul.f32 1.442695, %v1030_v51 }
 0x6bb   :  { %2038 = vpow2.f32 %v1032_v52 }
 0x6c8   :  { %v2039_v53 = vpop.eup %2038 }
 0x6c9   :  { %v1036_v54 = vsel %vm192_vm2, %v2039_v53, 0.0 }
 0x6ca   :  { %1037 = vadd.xlane.f32.xlu0 %v1036_v54 }
 0x6ef   :  { %v1029_v55 = vpop.xlane.xlu1 %1028 }
 0x6f0   :  { %v1031_v56 = vsub.f32 %v1023_v47, %v1029_v55  ;;  %v1576_v55 = vld [vmem:[#allocation8 + $0x10] sm:$0xff] }
 0x6f2   :  { %v1034_v57 = vmul.f32 1.442695, %v1031_v56  ;;  %v1575_v56 = vld [vmem:[#allocation8 + $0x8] sm:$0xff] }
 0x6f3   :  { %v1053_v58 = vpop.permute.xlu1 %1052 }
 0x6f4   :  { %2040 = vpow2.f32 %v1034_v57  ;;  %1960 = vmatpush3.msra.mxu0 %v1053_v58  ;;  %v1574_v57 = vld [vmem:[#allocation8] sm:$0xff] }
 0x6f5   :  { %1969 = vmatprep.subr.mxu0 %v2184_v9 }
 0x6f7   :  { %v1207_v4 = vpop.permute.xlu1 %1206 }
 0x6fb   :  { %v1285_v16 = vpop.permute.xlu1 %1284 }
 0x6ff   :  { %v1283_v18 = vpop.permute.xlu1 %1282 }
 0x701   :  { %v2041_v60 = vpop.eup %2040 }
 0x702   :  { %v1039_v62 = vsel %vm192_vm2, %v2041_v60, 0.0 }
 0x703   :  { %1040 = vadd.xlane.f32.xlu0 %v1039_v62 }
 0x719   :  { %1128 = vrot.lane.b32.xlu0 %v2318_v26, %s2193_s19 }
 0x71d   :  { %1204 = vrot.lane.b32.xlu0 %v2293_v13, %s2195_s23 }
 0x753   :  { %v1038_v14 = vpop.xlane.xlu0 %1037 }
 0x754   :  { %2042 = vrcp.f32 %v1038_v14 }
 0x761   :  { %v2043_v63 = vpop.eup %2042 }
 0x762   :  { %v1044_v0 = vmul.f32 %v2043_v63, %v1038_v14 }
 0x764   :  { %v1046_v1 = vsub.f32 2.0, %v1044_v0 }
 0x766   :  { %v1048_v2 = vmul.f32 %v2043_v63, %v1046_v1 }
 0x768   :  { %v1050_v3 = vmul.f32 %v2039_v53, %v1048_v2 }
 0x76a   :  { %1962 = vmatmul.mubr.msk.f32.vlgmr.msra.gmra.mxu0 %vm192_vm2, %v1050_v3 }
 0x76b   :  { %1970 = vmatpush3.xpose.msk.msra.mxu0 %vm192_vm2, %v1207_v4  ;;  %1971 = vmatprep.mubr.msk.f32.mxu0 %vm2185_vm1, %v2184_v9 }
 0x76c   :  { %1979 = vmatprep.subr.mxu0 %v2184_v9 }
 0x78c   :  { %v1041_v5 = vpop.xlane.xlu0 %1040 }
 0x78d   :  { %2044 = vrcp.f32 %v1041_v5 }
 0x790   :  { %v1129_v13 = vpop.permute.xlu0 %1128 }
 0x791   :  { %1965 = vmatpush3.msra.mxu1 %v1129_v13 }
 0x792   :  { %1974 = vmatprep.subr.mxu1 %v2184_v9 }
 0x794   :  { %v1205_v7 = vpop.permute.xlu0 %1204 }
 0x795   :  { %1972 = vmatmul.mubr.msk.f32.vlgmr.msra.gmra.mxu0 %vm192_vm2, %v1205_v7 }
 0x796   :  { %1981 = vmatprep.mubr.msk.f32.mxu0 %vm2185_vm1, %v2184_v9 }
 0x79a   :  { %v2045_v10 = vpop.eup %2044 }
 0x79b   :  { %v1045_v11 = vmul.f32 %v2045_v10, %v1041_v5 }
 0x79d   :  { %v1047_v12 = vsub.f32 2.0, %v1045_v11 }
 0x79f   :  { %v1049_v15 = vmul.f32 %v2045_v10, %v1047_v12 }
 0x7a1   :  { %v1051_v17 = vmul.f32 %v2041_v60, %v1049_v15 }
 0x7a3   :  { %1967 = vmatmul.mubr.msk.f32.vlgmr.msra.gmra.mxu1 %vm192_vm2, %v1051_v17 }
 0x7a4   :  { %1975 = vmatpush3.xpose.msk.msra.mxu1 %vm192_vm2, %v1285_v16  ;;  %1976 = vmatprep.mubr.msk.f32.mxu1 %vm2185_vm1, %v2184_v9 }
 0x7a5   :  { %1984 = vmatprep.subr.mxu1 %v2184_v9 }
 0x7a7   :  { %1977 = vmatmul.mubr.msk.f32.vlgmr.msra.gmra.mxu1 %vm192_vm2, %v1283_v18 }
 0x7a8   :  { %1986 = vmatprep.mubr.msk.f32.mxu1 %vm2185_vm1, %v2184_v9 }
 0x82a   :  { %v1124_v19 = vpop.f32.mrf.mxu0 }
 0x82c   :  { %v1963_v20 = vpop.f32.mrf.mxu0 }
 0x855   :  { %v1278_v21 = vpop.f32.mrf.mxu0 }
 0x856   :  { %v1360_v22 = vmul.f32 0.35355338, %v1278_v21 }
 0x857   :  { %v1973_v23 = vpop.f32.mrf.mxu0 }
 0x858   :  { %v1362_v24 = vsel %vm192_vm2, %v1360_v22, -inf }
 0x859   :  { %1363 = vmax.xlane.f32.xlu0 %v1362_v24 }
 0x863   :  { %v1200_v27 = vpop.f32.mrf.mxu1 }
 0x865   :  { %v1968_v28 = vpop.f32.mrf.mxu1 }
 0x867   :  { %v1356_v29 = vpop.f32.mrf.mxu1 }
 0x868   :  { %v1361_v30 = vmul.f32 0.35355338, %v1356_v29 }
 0x869   :  { %v1978_v31 = vpop.f32.mrf.mxu1 }
 0x86a   :  { %v1365_v32 = vsel %vm192_vm2, %v1361_v30, -inf }
 0x86b   :  { %1366 = vmax.xlane.f32.xlu1 %v1365_v32 }
 0x87c   :  { %1390 = vrot.lane.b32.xlu1 %v2314_v25, %s2196_s24 }
 0x880   :  { %1544 = vrot.lane.b32.xlu1 %v2377_v38, %s2181_s22 }
 0x884   :  { %1546 = vrot.lane.b32.xlu1 %v2380_v44, %s2181_s22 }
 0x888   :  { %1554 = vrot.lane.b32.xlu1 %v1200_v27, %s2197_s25 }
 0x8e2   :  { %v1364_v9 = vpop.xlane.xlu0 %1363 }
 0x8e3   :  { %v1368_v33 = vsub.f32 %v1360_v22, %v1364_v9 }
 0x8e5   :  { %v1370_v34 = vmul.f32 1.442695, %v1368_v33 }
 0x8e7   :  { %2046 = vpow2.f32 %v1370_v34 }
 0x8f4   :  { %v2047_v35 = vpop.eup %2046  ;;  %v1367_v36 = vpop.xlane.xlu1 %1366 }
 0x8f5   :  { %v1369_v37 = vsub.f32 %v1361_v30, %v1367_v36  ;;  %v1374_v39 = vsel %vm192_vm2, %v2047_v35, 0.0 }
 0x8f6   :  { %1375 = vadd.xlane.f32.xlu0 %v1374_v39 }
 0x8f7   :  { %v1372_v40 = vmul.f32 1.442695, %v1369_v37 }
 0x8f8   :  { %v1391_v25 = vpop.permute.xlu1 %1390 }
 0x8f9   :  { %2048 = vpow2.f32 %v1372_v40  ;;  %1980 = vmatpush3.msra.mxu0 %v1391_v25 }
 0x8fc   :  { %v1545_v63 = vpop.permute.xlu1 %1544 }
 0x8fd   :  { %v1566_v1 = vsel %vm192_vm2, %v2346_v59, %v1545_v63  ;;  %v1847_v59 = vld [vmem:[%s2465_s5] ss:$0 sm:$0xff] }
 0x900   :  { %v1547_v5 = vpop.permute.xlu1 %1546 }
 0x901   :  { %v1567_v7 = vsel %vm192_vm2, %v2348_v61, %v1547_v5 }
 0x904   :  { %v1555_v13 = vpop.permute.xlu1 %1554 }
 0x905   :  { %v1570_v10 = vsel %vm1568_vm4, %v1567_v7, %v1555_v13 }
 0x906   :  { %v2049_v38 = vpop.eup %2048 }
 0x907   :  { %v1377_v41 = vsel %vm192_vm2, %v2049_v38, 0.0 }
 0x908   :  { %1378 = vadd.xlane.f32.xlu0 %v1377_v41 }
 0x91e   :  { %1466 = vrot.lane.b32.xlu0 %v2318_v26, %s2196_s24  ;;  %v1577_v26 = vld [vmem:[#allocation8 + $0x18] sm:$0xff] }
 0x91f   :  { %1989 = vmatprep.subr.mxu0 %v1577_v26 }
 0x922   :  { %1552 = vrot.lane.b32.xlu0 %v1124_v19, %s2197_s25 }
 0x97f   :  { %v1376_v42 = vpop.xlane.xlu0 %1375 }
 0x980   :  { %2050 = vrcp.f32 %v1376_v42 }
 0x98d   :  { %v2051_v43 = vpop.eup %2050 }
 0x98e   :  { %v1382_v44 = vmul.f32 %v2051_v43, %v1376_v42 }
 0x990   :  { %v1384_v45 = vsub.f32 2.0, %v1382_v44 }
 0x991   :  { %v1379_v46 = vpop.xlane.xlu0 %1378 }
 0x992   :  { %v1386_v47 = vmul.f32 %v2051_v43, %v1384_v45  ;;  %2052 = vrcp.f32 %v1379_v46 }
 0x994   :  { %v1388_v48 = vmul.f32 %v2047_v35, %v1386_v47 }
 0x995   :  { %v1467_v49 = vpop.permute.xlu0 %1466 }
 0x996   :  { %1982 = vmatmul.mubr.msk.f32.vlgmr.msra.gmra.mxu0 %vm192_vm2, %v1388_v48  ;;  %1985 = vmatpush3.msra.mxu1 %v1467_v49 }
 0x997   :  { %1990 = vmatpush3.msra.mxu0 %v1577_v26 }
 0x998   :  { %1991 = vmatprep.subr.mxu0 %v1576_v55 }
 0x999   :  { %1992 = vmatpush3.msra.mxu0 %v1576_v55  ;;  %v1553_v0 = vpop.permute.xlu0 %1552  ;;  %v1851_v55 = vld [vmem:[%s2467_s7] ss:$0 sm:$0xff] }
 0x99a   :  { %1993 = vmatprep.subr.mxu0 %v1575_v56  ;;  %v1569_v2 = vsel %vm1568_vm4, %v1566_v1, %v1553_v0 }
 0x99b   :  { %1994 = vmatpush3.msra.mxu0 %v1575_v56 }
 0x99c   :  { %1995 = vmatprep.subr.mxu0 %v1574_v57 }
 0x99d   :  { %1996 = vmatpush3.msra.mxu0 %v1574_v57 }
 0x99f   :  { %v2053_v50 = vpop.eup %2052 }
 0x9a0   :  { %v1383_v51 = vmul.f32 %v2053_v50, %v1379_v46 }
 0x9a2   :  { %v1385_v52 = vsub.f32 2.0, %v1383_v51 }
 0x9a4   :  { %v1387_v53 = vmul.f32 %v2053_v50, %v1385_v52  ;;  %v1850_v52 = vld [vmem:[%s2466_s6] ss:$0 sm:$0xff] }
 0x9a6   :  { %v1389_v54 = vmul.f32 %v2049_v38, %v1387_v53 }
 0x9a8   :  { %1987 = vmatmul.mubr.msk.f32.vlgmr.msra.gmra.mxu1 %vm192_vm2, %v1389_v54 }
 0xa56   :  { %v1462_v58 = vpop.f32.mrf.mxu0 }
 0xa57   :  { %1560 = vrot.lane.b32.xlu0 %v1462_v58, %s2198_s26 }
 0xa58   :  { %v1983_v60 = vpop.f32.mrf.mxu0 }
 0xa68   :  { %v1538_v62 = vpop.f32.mrf.mxu1 }
 0xa69   :  { %1562 = vrot.lane.b32.xlu1 %v1538_v62, %s2198_s26 }
 0xa6a   :  { %v1988_v14 = vpop.f32.mrf.mxu1 }
 0xac9   :  { %v1561_v3 = vpop.permute.xlu0 %1560 }
 0xaca   :  { %v1572_v4 = vsel %vm1571_vm3, %v1569_v2, %v1561_v3 }
 0xacb   :  { %1997 = vmatprep.mubr.msk.f32.mxu0 %vm105_vm0, %v1572_v4 }
 0xadb   :  { %v1563_v11 = vpop.permute.xlu1 %1562 }
 0xadc   :  { %v1573_v12 = vsel %vm1571_vm3, %v1570_v10, %v1563_v11 }
 0xadd   :  { %1998 = vmatmul.mubr.msk.f32.vlgmr.msra.gmra.mxu0 %vm105_vm0, %v1573_v12 }
 0xb9d   :  { %v1999_v15 = vpop.f32.mrf.mxu0 }
 0xb9e   :  { %v1663_v16 = vadd.f32 %v1999_v15, %v1847_v59 }
 0xb9f   :  { %v1657_v17 = vpop.f32.mrf.mxu0 }
 0xba0   :  { %v1667_v18 = vmax.f32 %v1663_v16, 0.0  ;;  %v1658_v19 = vadd.f32 %v1847_v59, %v1657_v17 }
 0xba2   :  { %v1666_v20 = vmax.f32 %v1658_v19, 0.0  ;;  %v1673_v21 = vsel %vm105_vm0, %v1667_v18, 0.0 }
 0xba3   :  { %1674 = vadd.xlane.f32.xlu1 %v1673_v21 }
 0xba4   :  { %v1670_v61 = vsel %vm105_vm0, %v1666_v20, 0.0 }
 0xba5   :  { %1671 = vadd.xlane.f32.xlu0 %v1670_v61 }
 0xc2c   :  { %v1675_v22 = vpop.xlane.xlu1 %1674 }
 0xc2d   :  { %v1678_v23 = vmul.f32 0.03125, %v1675_v22 }
 0xc2e   :  { %v1672_v24 = vpop.xlane.xlu0 %1671 }
 0xc2f   :  { %v1677_v27 = vmul.f32 0.03125, %v1672_v24  ;;  %v1680_v28 = vsub.f32 %v1667_v18, %v1678_v23 }
 0xc31   :  { %v1679_v29 = vsub.f32 %v1666_v20, %v1677_v27  ;;  %v1682_v32 = vmul.f32 %v1680_v28, %v1680_v28  ;;  %v1722_v58 = vmul.f32 %v1850_v52, %v1680_v28 }
 0xc33   :  { %v1681_v30 = vmul.f32 %v1679_v29, %v1679_v29  ;;  %v1686_v9 = vsel %vm105_vm0, %v1682_v32, 0.0  ;;  %v1721_v53 = vmul.f32 %v1850_v52, %v1679_v29 }
 0xc35   :  { %v1683_v31 = vsel %vm105_vm0, %v1681_v30, 0.0 }
 0xc36   :  { %1684 = vadd.xlane.f32.xlu0 %v1683_v31 }
 0xc3a   :  { %1687 = vadd.xlane.f32.xlu0 %v1686_v9 }
 0xcbf   :  { %v1685_v33 = vpop.xlane.xlu0 %1684 }
 0xcc0   :  { %v1689_v34 = vmul.f32 0.032258064, %v1685_v33  ;;  %v1852_v33 = vld [vmem:[%s2468_s8] ss:$0 sm:$0xff]  ;;  %s2150_s8 = scalar_lea.vmem %s1807_s2, 256 }
 0xcc1   :  { %p2151_p6 = scmp.ne.s32.totalorder %s1807_s2, %s2150_s8  ;;  %p2156_p8 = scmp.lt.s32.totalorder %s2150_s8, %s2150_s8 }
 0xcc2   :  { %2054 = vrsqrt.f32 %v1689_v34  ;;  %vm1693_vm5 = vcmp.eq.f32.partialorder %v1689_v34, inf  ;;  %v1696_v40 = vand.u32 2147483648, %v1689_v34  ;;  %vm1695_vm6 = vcmp.eq.f32.partialorder %v1689_v34, 0.0 }
 0xcc3   :  { %v1688_v35 = vpop.xlane.xlu0 %1687  ;;  %p2157_p9 = por %p2156_p8, %p2155_p7 }
 0xcc4   :  { %v1690_v36 = vmul.f32 0.032258064, %v1688_v35 }
 0xcc5   :  { %p2158_p10 = pnand %p2157_p9, %p2151_p6 }
 0xcc6   :  { %2056 = vrsqrt.f32 %v1690_v36  ;;  %vm1700_vm7 = vcmp.eq.f32.partialorder %v1690_v36, inf  ;;  %v1703_v44 = vand.u32 2147483648, %v1690_v36  ;;  %vm1702_vm8 = vcmp.eq.f32.partialorder %v1690_v36, 0.0 }
 0xccf   :  { %v2055_v37 = vpop.eup %2054 }
 0xcd0   :  { %v1692_v39 = vmul.f32 %v2055_v37, %v1689_v34 }
 0xcd2   :  { %v1694_v25 = vsel %vm1693_vm5, %v1689_v34, %v1692_v39 }
 0xcd3   :  { %v2057_v38 = vpop.eup %2056  ;;  %v1697_v41 = vsel %vm1695_vm6, %v1696_v40, %v1694_v25  ;;  %v1853_v40 = vld [vmem:[%s2469_s9] ss:$0 sm:$0xff] }
 0xcd4   :  { %v1699_v42 = vmul.f32 %v2057_v38, %v1690_v36  ;;  %v1705_v43 = vadd.f32 1e-06, %v1697_v41 }
 0xcd6   :  { %2058 = vrcp.f32 %v1705_v43  ;;  %v1701_v45 = vsel %vm1700_vm7, %v1690_v36, %v1699_v42 }
 0xcd7   :  { %v1704_v46 = vsel %vm1702_vm8, %v1703_v44, %v1701_v45 }
 0xcd8   :  { %v1706_v47 = vadd.f32 1e-06, %v1704_v46 }
 0xcda   :  { %2060 = vrcp.f32 %v1706_v47 }
 0xce3   :  { %v2059_v48 = vpop.eup %2058 }
 0xce4   :  { %v1709_v49 = vmul.f32 %v2059_v48, %v1705_v43 }
 0xce6   :  { %v1711_v50 = vsub.f32 2.0, %v1709_v49 }
 0xce7   :  { %v2061_v51 = vpop.eup %2060 }
 0xce8   :  { %v1713_v54 = vmul.f32 %v2059_v48, %v1711_v50  ;;  %v1710_v26 = vmul.f32 %v2061_v51, %v1706_v47 }
 0xcea   :  { %v1723_v56 = vmul.f32 %v1721_v53, %v1713_v54  ;;  %v1712_v57 = vsub.f32 2.0, %v1710_v26 }
 0xcec   :  { %v1731_v60 = vadd.f32 %v1851_v55, %v1723_v56  ;;  %v1714_v62 = vmul.f32 %v2061_v51, %v1712_v57 }
 0xcee   :  { %v1733_v14 = vadd.f32 %v1731_v60, %v2276_v6  ;;  %v1724_v63 = vmul.f32 %v1722_v58, %v1714_v62 }
 0xcf0   :  { %v1737_v0 = vsel %vm105_vm0, %v1733_v14, 0.0  ;;  %v1732_v1 = vadd.f32 %v1851_v55, %v1724_v63 }
 0xcf1   :  { %1738 = vadd.xlane.f32.xlu1 %v1737_v0 }
 0xcf2   :  { %v1734_v2 = vadd.f32 %v1732_v1, %v2278_v8 }
 0xcf4   :  { %v1740_v3 = vsel %vm105_vm0, %v1734_v2, 0.0 }
 0xcf5   :  { %1741 = vadd.xlane.f32.xlu0 %v1740_v3 }
 0xd7a   :  { %v1739_v4 = vpop.xlane.xlu1 %1738 }
 0xd7b   :  { %v1743_v5 = vmul.f32 0.03125, %v1739_v4 }
 0xd7d   :  { %v1745_v13 = vsub.f32 %v1733_v14, %v1743_v5 }
 0xd7e   :  { %v1742_v7 = vpop.xlane.xlu0 %1741 }
 0xd7f   :  { %v1744_v10 = vmul.f32 0.03125, %v1742_v7  ;;  %v1747_v11 = vmul.f32 %v1745_v13, %v1745_v13  ;;  %v1787_v36 = vmul.f32 %v1852_v33, %v1745_v13 }
 0xd81   :  { %v1746_v12 = vsub.f32 %v1734_v2, %v1744_v10  ;;  %v1749_v59 = vsel %vm105_vm0, %v1747_v11, 0.0 }
 0xd82   :  { %1750 = vadd.xlane.f32.xlu1 %v1749_v59 }
 0xd83   :  { %v1748_v6 = vmul.f32 %v1746_v12, %v1746_v12  ;;  %v1788_v41 = vmul.f32 %v1852_v33, %v1746_v12 }
 0xd85   :  { %v1752_v15 = vsel %vm105_vm0, %v1748_v6, 0.0 }
 0xd86   :  { %1753 = vadd.xlane.f32.xlu0 %v1752_v15 }
 0xe0b   :  { %v1751_v16 = vpop.xlane.xlu1 %1750 }
 0xe0c   :  { %v1755_v17 = vmul.f32 0.032258064, %v1751_v16 }
 0xe0e   :  { %2062 = vrsqrt.f32 %v1755_v17  ;;  %vm1759_vm9 = vcmp.eq.f32.partialorder %v1755_v17, inf  ;;  %v1762_v21 = vand.u32 2147483648, %v1755_v17  ;;  %vm1761_vm10 = vcmp.eq.f32.partialorder %v1755_v17, 0.0 }
 0xe0f   :  { %v1754_v8 = vpop.xlane.xlu0 %1753 }
 0xe10   :  { %v1756_v18 = vmul.f32 0.032258064, %v1754_v8 }
 0xe12   :  { %2064 = vrsqrt.f32 %v1756_v18  ;;  %vm1766_vm11 = vcmp.eq.f32.partialorder %v1756_v18, inf  ;;  %v1769_v28 = vand.u32 2147483648, %v1756_v18  ;;  %vm1768_vm12 = vcmp.eq.f32.partialorder %v1756_v18, 0.0 }
 0xe1b   :  { %v2063_v19 = vpop.eup %2062 }
 0xe1c   :  { %v1758_v20 = vmul.f32 %v2063_v19, %v1755_v17 }
 0xe1e   :  { %v1760_v61 = vsel %vm1759_vm9, %v1755_v17, %v1758_v20 }
 0xe1f   :  { %v2065_v22 = vpop.eup %2064  ;;  %v1763_v23 = vsel %vm1761_vm10, %v1762_v21, %v1760_v61 }
 0xe20   :  { %v1765_v24 = vmul.f32 %v2065_v22, %v1756_v18  ;;  %v1771_v27 = vadd.f32 1e-06, %v1763_v23 }
 0xe22   :  { %v1767_v29 = vsel %vm1766_vm11, %v1756_v18, %v1765_v24  ;;  %2066 = vrcp.f32 %v1771_v27 }
 0xe23   :  { %v1770_v30 = vsel %vm1768_vm12, %v1769_v28, %v1767_v29 }
 0xe24   :  { %v1772_v31 = vadd.f32 1e-06, %v1770_v30 }
 0xe26   :  { %2068 = vrcp.f32 %v1772_v31 }
 0xe2f   :  { %v2067_v32 = vpop.eup %2066 }
 0xe30   :  { %v1775_v9 = vmul.f32 %v2067_v32, %v1771_v27 }
 0xe32   :  { %v1777_v34 = vsub.f32 2.0, %v1775_v9 }
 0xe33   :  { %v2069_v35 = vpop.eup %2068 }
 0xe34   :  { %v1776_v37 = vmul.f32 %v2069_v35, %v1772_v31  ;;  %v1779_v39 = vmul.f32 %v2067_v32, %v1777_v34 }
 0xe36   :  { %v1778_v25 = vsub.f32 2.0, %v1776_v37  ;;  %v1789_v38 = vmul.f32 %v1787_v36, %v1779_v39 }
 0xe38   :  { %v1780_v42 = vmul.f32 %v2069_v35, %v1778_v25  ;;  %v1797_v43 = vadd.f32 %v1853_v40, %v1789_v38 }
 0xe3a   :  { %v1790_v44 = vmul.f32 %v1788_v41, %v1780_v42  ;;  %1799 = vst.msk [vmem:[#allocation10] sm:$0xff] %vm105_vm0, %v1797_v43 }
 0xe3c   :  { %v1798_v45 = vadd.f32 %v1853_v40, %v1790_v44 }
 0xe3e   :  { %1800 = vst.msk [vmem:[#allocation10 + $0x8] sm:$0xff] %vm105_vm0, %v1798_v45 }
 0xe3f   :  { %2161 = shalt.err (!%p2158_p10)
}
 0xe40   :  { %1812 = dma.vmem_to_hbm [thread:$0]  %s1807_s2, 256, %s2470_s10, [#allocation4], %s2180_s21, %s2180_s21, %s2181_s22  }
 0xe41   :  { %2176 = dma.done.wait [#allocation4], 256  }
 0xe42   :  { %2177 = vsyncadd [#allocation4], 4294967040 }
 0xe43   :  { %1816 = vsyncpa [#allocation3], 1 }
 0xe44   :  { %1817 = vsyncpa [#allocation6], 1 }
 0xe45   :  { %1818 = vsyncpa [#allocation9], 1 }
 0xe46   :  { %1819 = vsyncpa [#allocation4], 1 }

</bundles_post_ra>
